<compile_context>
chip_gen: v6e
topology: v6e:2x2x1
jax: 0.10.0
libtpu: 0.0.40
codegen_flags: <defaults>
</compile_context>

<pallas_src>
import functools

import jax
import jax.numpy as jnp
from jax.experimental import pallas as pl
from jax.experimental.pallas import tpu as pltpu


def _round_up(x, m):
    return ((x + m - 1) // m) * m


def _vmem_budget_bytes():
    """Physical VMEM of this chip minus headroom (falls back to 128 MiB)."""
    try:
        cap = int(pltpu.get_tpu_info().vmem_capacity_bytes)
    except Exception:
        cap = 128 * 1024 * 1024
    headroom = 16 * 1024 * 1024
    return max(cap - headroom, 16 * 1024 * 1024)


def mlp_kernel(x_ref, gamma_ref, beta_ref, w_ref, b_ref, o_ref, y_ref):
    # x_ref: (TM, C_in); gamma/beta: (1, C_in); w: (C_in, TN); b: (1, TN)
    # o_ref: (TM, TN);   y_ref: (TM, C_in) VMEM scratch (normalized rows).
    #
    # LayerNorm is computed once per row tile (first C_out tile) and reused for
    # every subsequent j step -> VALU work is not repeated across the C_out axis.
    @pl.when(pl.program_id(1) == 0)
    def _():
        xf = x_ref[...].astype(jnp.float32)
        mean = jnp.mean(xf, axis=-1, keepdims=True)
        centered = xf - mean
        var = jnp.mean(centered * centered, axis=-1, keepdims=True)
        xn = centered * jax.lax.rsqrt(var + 1e-5)
        y = xn * gamma_ref[...].astype(jnp.float32) + beta_ref[...].astype(jnp.float32)
        # Store in the matmul compute dtype (weight dtype) so the MXU runs at
        # its native rate for bf16 weights; f32 weights stay f32.
        y_ref[...] = y.astype(y_ref.dtype)

    out = jnp.dot(y_ref[...], w_ref[...], preferred_element_type=jnp.float32)
    out = out + b_ref[...].astype(jnp.float32)
    o_ref[...] = out.astype(o_ref.dtype)


def prepare_mlp_params(gamma, beta, weight, bias, *, compute_dtype=None):
    """Pre-transpose / lane-pad the Linear params once (not per forward call).

    gamma, beta: (C_in,)    weight: (C_out, C_in)   bias: (C_out,)
    compute_dtype: optionally cast the weight (e.g. to bf16 on v5e) -- changes
                   numerics slightly, so it is opt-in.
    """
    c_out, c_in = weight.shape
    c_out_p = _round_up(c_out, 128)  # lane-dense output -> unmasked vst
    w2 = weight.T  # (C_in, C_out)
    b2 = bias.reshape(1, c_out)
    if c_out_p != c_out:
        w2 = jnp.pad(w2, ((0, 0), (0, c_out_p - c_out)))
        b2 = jnp.pad(b2, ((0, 0), (0, c_out_p - c_out)))
    if compute_dtype is not None:
        w2 = w2.astype(compute_dtype)
    return {
        "gamma": gamma.reshape(1, c_in),
        "beta": beta.reshape(1, c_in),
        "w": w2,
        "b": b2,
        "c_out": c_out,
    }


def _choose_tiles(n, c_in, c_out_p, act_bytes, w_bytes, budget,
                  tile_m=None, tile_n=None):
    # --- C_out tile: keep the whole padded weight resident when it is small
    # relative to the VMEM budget (weight then streams from HBM exactly once).
    if tile_n is None:
        resident_weight_bytes = 2 * c_in * c_out_p * w_bytes  # double-buffered
        if resident_weight_bytes <= budget // 3:
            tile_n = c_out_p
        else:
            tile_n = min(c_out_p, 512)

    # --- Row tile: size from what actually lives in VMEM per row, including
    # the f32 LN/matmul intermediates (not just the pipelined I/O buffers).
    if tile_m is None:
        per_row = (2 * c_in * act_bytes      # x double buffer
                   + 2 * tile_n * act_bytes  # out double buffer
                   + c_in * w_bytes          # normalized-row scratch
                   + 3 * c_in * 4            # f32 LN temporaries
                   + tile_n * 4)             # f32 matmul result
        fixed = 2 * c_in * tile_n * w_bytes + 4 * (2 * c_in + tile_n) * 4
        avail = max(budget - fixed, 8 * per_row)
        max_tile_m = min(512, (avail // per_row) // 8 * 8)
        max_tile_m = max(max_tile_m, 8)
        if n <= max_tile_m:
            if n >= 256:
                # Split the "parallel" row axis into >=2 steps so v7x's two
                # TensorCores both run; harmless on single-TC v5e/v6e.
                tile_m = _round_up((n + 1) // 2, 8)
            else:
                tile_m = n  # full-extent block (allowed even if not 8-aligned)
        else:
            tile_m = max_tile_m
    return tile_m, tile_n


def mlp_pallas_prepared(x, params, *, tile_m=None, tile_n=None):
    """x: (..., C_in) -> (..., C_out) using pre-prepared params."""
    orig_shape = x.shape
    c_in = orig_shape[-1]
    w2, b2 = params["w"], params["b"]
    gamma2, beta2 = params["gamma"], params["beta"]
    c_out = params["c_out"]
    c_out_p = w2.shape[1]

    x2 = x.reshape(-1, c_in)
    n = x2.shape[0]

    act_bytes = jnp.dtype(x.dtype).itemsize
    w_bytes = jnp.dtype(w2.dtype).itemsize
    budget = _vmem_budget_bytes()

    tile_m, tile_n = _choose_tiles(n, c_in, c_out_p, act_bytes, w_bytes, budget,
                                   tile_m=tile_m, tile_n=tile_n)

    grid = (pl.cdiv(n, tile_m), pl.cdiv(c_out_p, tile_n))

    # VMEM estimate including the f32 intermediates, capped by the chip budget.
    tile_vmem = (2 * tile_m * c_in * act_bytes
                 + 2 * tile_m * tile_n * act_bytes
                 + 2 * c_in * tile_n * w_bytes
                 + tile_m * c_in * w_bytes
                 + 3 * tile_m * c_in * 4
                 + tile_m * tile_n * 4
                 + 4 * (2 * c_in + tile_n) * 4)
    vmem_limit = min(max(int(1.5 * tile_vmem), 32 * 1024 * 1024), budget)

    # TODO(synk): for very large C_in (>= ~8K f32) add a K reduction grid axis
    # with an f32 accumulator (LayerNorm stats then need a two-pass scheme), and
    # for huge non-resident weights consider swapping grid-axis order so the
    # weight (rather than the activations) is the stream-once operand.
    out = pl.pallas_call(
        mlp_kernel,
        out_shape=jax.ShapeDtypeStruct((n, c_out_p), x.dtype),
        grid_spec=pltpu.PrefetchScalarGridSpec(
            num_scalar_prefetch=0,
            grid=grid,
            in_specs=[
                pl.BlockSpec((tile_m, c_in), lambda i, j: (i, 0)),   # x rows
                pl.BlockSpec((1, c_in), lambda i, j: (0, 0)),        # gamma
                pl.BlockSpec((1, c_in), lambda i, j: (0, 0)),        # beta
                pl.BlockSpec((c_in, tile_n), lambda i, j: (0, j)),   # W^T tile
                pl.BlockSpec((1, tile_n), lambda i, j: (0, j)),      # bias tile
            ],
            out_specs=pl.BlockSpec((tile_m, tile_n), lambda i, j: (i, j)),
            scratch_shapes=[pltpu.VMEM((tile_m, c_in), w2.dtype)],   # normalized rows
        ),
        compiler_params=pltpu.CompilerParams(
            # j (C_out) must iterate innermost so the LN scratch is reused;
            # i stays "parallel" for megacore sharding on v7x.
            dimension_semantics=("parallel", "arbitrary"),
            vmem_limit_bytes=vmem_limit,
        ),
    )(x2, gamma2, beta2, w2, b2)

    if c_out_p != c_out:
        out = out[:, :c_out]
    return out.reshape(*orig_shape[:-1], c_out)


def mlp_pallas(x, gamma, beta, weight, bias, *, tile_m=None, tile_n=None):
    """Convenience wrapper: prepares params per call (prefer prepare_mlp_params)."""
    params = prepare_mlp_params(gamma, beta, weight, bias)
    return mlp_pallas_prepared(x, params, tile_m=tile_m, tile_n=tile_n)


def mlp_reference(x, gamma, beta, weight, bias):
    xf = x.astype(jnp.float32)
    mean = jnp.mean(xf, axis=-1, keepdims=True)
    var = jnp.mean((xf - mean) ** 2, axis=-1, keepdims=True)
    xn = (xf - mean) * jax.lax.rsqrt(var + 1e-5)
    y = xn * gamma + beta
    return (y @ weight.T + bias).astype(x.dtype)


if __name__ == "__main__":
    key = jax.random.PRNGKey(0)
    in_channels, out_channels = 32, 64
    batch, seq = 2, 8  # x: (batch, seq, in_channels)

    k_x, k_w, k_b, k_g, k_be = jax.random.split(key, 5)
    x = jax.random.normal(k_x, (batch, seq, in_channels), dtype=jnp.float32)

    # Deterministic parameter init (synthetic, not a checkpoint).
    weight = jax.random.normal(k_w, (out_channels, in_channels), jnp.float32) * 0.05
    bias = jax.random.normal(k_b, (out_channels,), jnp.float32) * 0.01
    gamma = jnp.ones((in_channels,), jnp.float32) + 0.1 * jax.random.normal(
        k_g, (in_channels,), jnp.float32)
    beta = 0.1 * jax.random.normal(k_be, (in_channels,), jnp.float32)

    # Parameters prepared once (pre-transpose + lane-pad), reused across calls.
    params = prepare_mlp_params(gamma, beta, weight, bias)
    out = mlp_pallas_prepared(x, params)
    out = jax.block_until_ready(out)

    ref = mlp_reference(x, gamma, beta, weight, bias)
    assert out.shape == (batch, seq, out_channels)
    assert jnp.allclose(out, ref, atol=1e-4, rtol=1e-4), (
        float(jnp.max(jnp.abs(out - ref))))
    print("KERNEL_OK")
</pallas_src>

<mosaic_0001>
module attributes {stable_mosaic.version = 11 : i64} {
  func.func @mlp_kernel(%arg0: i32, %arg1: i32, %arg2: memref<16x32xf32, #tpu.memory_space<vmem>>, %arg3: memref<1x32xf32, #tpu.memory_space<vmem>>, %arg4: memref<1x32xf32, #tpu.memory_space<vmem>>, %arg5: memref<32x128xf32, #tpu.memory_space<vmem>>, %arg6: memref<1x128xf32, #tpu.memory_space<vmem>>, %arg7: memref<16x128xf32, #tpu.memory_space<vmem>>, %arg8: memref<16x32xf32, #tpu.memory_space<vmem>>) attributes {dimension_semantics = [#tpu.dimension_semantics<parallel>, #tpu.dimension_semantics<arbitrary>], iteration_bounds = array<i64: 1, 1>, scalar_prefetch = 0 : i64, scratch_operands = 1 : i64, tpu.core_type = #tpu.core_type<tc>, window_params = [{transform_indices = @transform_0, window_bounds = array<i64: 16, 32>}, {pipeline_mode = #tpu.pipeline_mode<synchronous>, transform_indices = @transform_1, window_bounds = array<i64: 1, 32>}, {pipeline_mode = #tpu.pipeline_mode<synchronous>, transform_indices = @transform_2, window_bounds = array<i64: 1, 32>}, {transform_indices = @transform_3, window_bounds = array<i64: 32, 128>}, {transform_indices = @transform_4, window_bounds = array<i64: 1, 128>}, {transform_indices = @transform_5, window_bounds = array<i64: 16, 128>}]} {
    %c0_i32 = arith.constant 0 : i32
    %0 = arith.cmpi eq, %arg1, %c0_i32 : i32
    %1 = arith.extui %0 : i1 to i32
    %c0_i32_0 = arith.constant 0 : i32
    %2 = arith.cmpi ne, %1, %c0_i32_0 : i32
    scf.if %2 {
      %c0_8 = arith.constant 0 : index
      %c0_9 = arith.constant 0 : index
      %10 = vector.load %arg2[%c0_8, %c0_9] : memref<16x32xf32, #tpu.memory_space<vmem>>, vector<16x32xf32>
      %cst_10 = arith.constant dense<0.000000e+00> : vector<16xf32>
      %11 = vector.multi_reduction <add>, %10, %cst_10 [1] : vector<16x32xf32> to vector<16xf32>
      %12 = vector.shape_cast %11 : vector<16xf32> to vector<16x1xf32>
      %cst_11 = arith.constant 3.200000e+01 : f32
      %13 = vector.broadcast %cst_11 : f32 to vector<16x1xf32>
      %14 = arith.divf %12, %13 : vector<16x1xf32>
      %15 = vector.broadcast %14 : vector<16x1xf32> to vector<16x32xf32>
      %16 = arith.subf %10, %15 : vector<16x32xf32>
      %17 = arith.mulf %16, %16 : vector<16x32xf32>
      %cst_12 = arith.constant dense<0.000000e+00> : vector<16xf32>
      %18 = vector.multi_reduction <add>, %17, %cst_12 [1] : vector<16x32xf32> to vector<16xf32>
      %19 = vector.shape_cast %18 : vector<16xf32> to vector<16x1xf32>
      %cst_13 = arith.constant 3.200000e+01 : f32
      %20 = vector.broadcast %cst_13 : f32 to vector<16x1xf32>
      %21 = arith.divf %19, %20 : vector<16x1xf32>
      %cst_14 = arith.constant 9.99999974E-6 : f32
      %22 = vector.broadcast %cst_14 : f32 to vector<16x1xf32>
      %23 = arith.addf %21, %22 : vector<16x1xf32>
      %24 = math.rsqrt %23 : vector<16x1xf32>
      %25 = vector.broadcast %24 : vector<16x1xf32> to vector<16x32xf32>
      %26 = arith.mulf %16, %25 : vector<16x32xf32>
      %c0_15 = arith.constant 0 : index
      %c0_16 = arith.constant 0 : index
      %27 = vector.load %arg3[%c0_15, %c0_16] : memref<1x32xf32, #tpu.memory_space<vmem>>, vector<1x32xf32>
      %28 = vector.broadcast %27 : vector<1x32xf32> to vector<16x32xf32>
      %29 = arith.mulf %26, %28 : vector<16x32xf32>
      %c0_17 = arith.constant 0 : index
      %c0_18 = arith.constant 0 : index
      %30 = vector.load %arg4[%c0_17, %c0_18] : memref<1x32xf32, #tpu.memory_space<vmem>>, vector<1x32xf32>
      %31 = vector.broadcast %30 : vector<1x32xf32> to vector<16x32xf32>
      %32 = arith.addf %29, %31 : vector<16x32xf32>
      %c0_19 = arith.constant 0 : index
      %c0_20 = arith.constant 0 : index
      %33 = vector.load %arg8[%c0_19, %c0_20] : memref<16x32xf32, #tpu.memory_space<vmem>>, vector<16x32xf32>
      tpu.vector_store %arg8[%c0_19, %c0_20], %32 {strides = array<i32>} : memref<16x32xf32, #tpu.memory_space<vmem>>, vector<16x32xf32>,
    } else {
    }
    %c0 = arith.constant 0 : index
    %c0_1 = arith.constant 0 : index
    %3 = vector.load %arg8[%c0, %c0_1] : memref<16x32xf32, #tpu.memory_space<vmem>>, vector<16x32xf32>
    %c0_2 = arith.constant 0 : index
    %c0_3 = arith.constant 0 : index
    %4 = vector.load %arg5[%c0_2, %c0_3] : memref<32x128xf32, #tpu.memory_space<vmem>>, vector<32x128xf32>
    %cst = arith.constant dense<0.000000e+00> : vector<16x128xf32>
    %5 = tpu.matmul %3, %4, %cst {dimension_numbers = #tpu.dot_dimension_numbers<[1], [0], [0], [1], [0, 0, 1, 1], [], []>} : vector<16x32xf32>, vector<32x128xf32>, vector<16x128xf32> -> vector<16x128xf32>
    %c0_4 = arith.constant 0 : index
    %c0_5 = arith.constant 0 : index
    %6 = vector.load %arg6[%c0_4, %c0_5] : memref<1x128xf32, #tpu.memory_space<vmem>>, vector<1x128xf32>
    %7 = vector.broadcast %6 : vector<1x128xf32> to vector<16x128xf32>
    %8 = arith.addf %5, %7 : vector<16x128xf32>
    %c0_6 = arith.constant 0 : index
    %c0_7 = arith.constant 0 : index
    %9 = vector.load %arg7[%c0_6, %c0_7] : memref<16x128xf32, #tpu.memory_space<vmem>>, vector<16x128xf32>
    tpu.vector_store %arg7[%c0_6, %c0_7], %8 {strides = array<i32>} : memref<16x128xf32, #tpu.memory_space<vmem>>, vector<16x128xf32>,
    return
  }
  func.func @transform_0(%arg0: i32, %arg1: i32) -> (i32, i32) {
    %c0_i32 = arith.constant 0 : i32
    %c0_i32_0 = arith.constant 0 : i32
    return %arg0, %c0_i32 : i32, i32
  }
  func.func @transform_1(%arg0: i32, %arg1: i32) -> (i32, i32) {
    %c0_i32 = arith.constant 0 : i32
    %c0_i32_0 = arith.constant 0 : i32
    %c0_i32_1 = arith.constant 0 : i32
    return %c0_i32, %c0_i32_0 : i32, i32
  }
  func.func @transform_2(%arg0: i32, %arg1: i32) -> (i32, i32) {
    %c0_i32 = arith.constant 0 : i32
    %c0_i32_0 = arith.constant 0 : i32
    %c0_i32_1 = arith.constant 0 : i32
    return %c0_i32, %c0_i32_0 : i32, i32
  }
  func.func @transform_3(%arg0: i32, %arg1: i32) -> (i32, i32) {
    %c0_i32 = arith.constant 0 : i32
    %c0_i32_0 = arith.constant 0 : i32
    return %c0_i32, %arg1 : i32, i32
  }
  func.func @transform_4(%arg0: i32, %arg1: i32) -> (i32, i32) {
    %c0_i32 = arith.constant 0 : i32
    %c0_i32_0 = arith.constant 0 : i32
    return %c0_i32, %arg1 : i32, i32
  }
  func.func @transform_5(%arg0: i32, %arg1: i32) -> (i32, i32) {
    %c0_i32 = arith.constant 0 : i32
    return %arg0, %arg1 : i32, i32
  }
}

</mosaic_0001>

<bundles_post_ra>
// kernel: tpu_custom_call.1
= control target key start
LH: loop header
LB: loop body
LE: loop exit
PB: predicated region body
PF: predicated region fallthrough
CT: control target
= control target key end

     0   :  { %10 = vsyncpa [#allocation4], 0  ;;  %s385_s0 = inlined_call_operand.hbm [shape: f32[16,32], index: 0, kind: input, shape index: {}]   ;;  %s386_s1 = inlined_call_operand.vmem [shape: f32[1,32], index: 1, kind: input, shape index: {}]   ;;  %s387_s2 = inlined_call_operand.vmem [shape: f32[1,32], index: 2, kind: input, shape index: {}]   ;;  %s388_s3 = inlined_call_operand.hbm [shape: f32[32,128], index: 3, kind: input, shape index: {}]   ;;  %s389_s4 = inlined_call_operand.vmem [shape: f32[1,128], index: 4, kind: input, shape index: {}]   ;;  %s390_s5 = inlined_call_operand.hbm [shape: f32[16,128], index: 5, kind: output, shape index: {}]  }
   0x1   :  { %11 = vsyncpa [#allocation7], 0 }
   0x2   :  { %12 = vsyncpa [#allocation5], 0  ;;  %s315_s18 = smov [#allocation3]  }
   0x3   :  { %s18_s19 = sshll.u32 %s315_s18, 4  ;;  %s19_s19 = int_to_ptr.vmem [resolvable:$true] %s18_s19 }
   0x4   :  { %s257_s20 = scalar_lea.vmem %s19_s19, 256  ;;  %p262_p1 = scmp.lt.s32.totalorder %s19_s19, %s19_s19 }
   0x5   :  { %p258_p0 = scmp.ne.s32.totalorder %s19_s19, %s257_s20  ;;  %p263_p2 = scmp.lt.s32.totalorder %s257_s20, %s257_s20 }
   0x7   :  { %p264_p3 = por %p263_p2, %p262_p1 }
   0x9   :  { %p265_p4 = pnand %p264_p3, %p258_p0 }
   0xb   :  { %268 = shalt.err (!%p265_p4)
}
   0xc   :  { %s316_s21 = smov 128   ;;  %s317_s22 = smov 8  }
   0xd   :  { %24 = dma.hbm_to_vmem [thread:$0]  %s385_s0, 256, %s19_s19, [#allocation4], %s316_s21, %s316_s21, %s317_s22  }
   0xe   :  { %s318_s25 = smov [#allocation6]  }
   0xf   :  { %s34_s26 = sshll.u32 %s318_s25, 4  ;;  %s35_s26 = int_to_ptr.vmem [resolvable:$true] %s34_s26 }
  0x10   :  { %s277_s27 = scalar_lea.vmem %s35_s26, 512  ;;  %p282_p6 = scmp.lt.s32.totalorder %s35_s26, %s35_s26 }
  0x11   :  { %p278_p5 = scmp.ne.s32.totalorder %s35_s26, %s277_s27  ;;  %p283_p7 = scmp.lt.s32.totalorder %s277_s27, %s277_s27 }
  0x13   :  { %p284_p8 = por %p283_p7, %p282_p6 }
  0x15   :  { %p285_p9 = pnand %p284_p8, %p278_p5 }
  0x17   :  { %288 = shalt.err (!%p285_p9)
}
  0x18   :  { %40 = dma.hbm_to_vmem [thread:$0]  %s388_s3, 512, %s35_s26, [#allocation7], %s316_s21, %s316_s21, %s317_s22  }
  0x19   :  { %309 = dma.done.wait [#allocation4], 256  }
  0x1a   :  { %310 = vsyncadd [#allocation4], 4294967040 }
  0x1b   :  { %311 = dma.done.wait [#allocation7], 512  }
  0x1c   :  { %312 = vsyncadd [#allocation7], 4294966784  ;;  %vm55_vm0 = vcmask 261120   ;;  %v53_v0 = vld [vmem:[#allocation3] sm:$0xff]  ;;  %v54_v1 = vld [vmem:[#allocation3 + $0x8] sm:$0xff] }
  0x1d   :  { %v56_v2 = vsel %vm55_vm0, %v53_v0, 0.0  ;;  %v59_v3 = vsel %vm55_vm0, %v54_v1, 0.0  ;;  %v108_v14 = vld [vmem:[#allocation6 + $0x18] sm:$0xff]  ;;  %v107_v15 = vld [vmem:[#allocation6 + $0x10] sm:$0xff]  ;;  %v106_v16 = vld [vmem:[#allocation6 + $0x8] sm:$0xff] }
  0x1e   :  { %57 = vadd.xlane.f32.xlu0 %v56_v2  ;;  %229 = vmatprep.subr.mxu0 %v108_v14  ;;  %v105_v17 = vld [vmem:[#allocation6] sm:$0xff] }
  0x1f   :  { %230 = vmatpush3.msra.mxu0 %v108_v14  ;;  %v218_v25 = vld [vmem:[%s386_s1] ss:$0 sm:$0xff] }
  0x20   :  { %231 = vmatprep.subr.mxu0 %v107_v15  ;;  %v219_v27 = vld [vmem:[%s387_s2] ss:$0 sm:$0xff]  ;;  %s319_s2 = smov [#allocation8]  }
  0x21   :  { %232 = vmatpush3.msra.mxu0 %v107_v15  ;;  %v220_v36 = vld [vmem:[%s389_s4] ss:$0 sm:$0xff]  ;;  %s205_s8 = sshll.u32 %s319_s2, 4  ;;  %s206_s8 = int_to_ptr.vmem [resolvable:$true] %s205_s8 }
  0x22   :  { %60 = vadd.xlane.f32.xlu0 %v59_v3  ;;  %233 = vmatprep.subr.mxu0 %v106_v16  ;;  %s289_s9 = scalar_lea.vmem %s206_s8, 256  ;;  %p294_p11 = scmp.lt.s32.totalorder %s206_s8, %s206_s8 }
  0x23   :  { %234 = vmatpush3.msra.mxu0 %v106_v16  ;;  %p290_p10 = scmp.ne.s32.totalorder %s206_s8, %s289_s9  ;;  %p295_p12 = scmp.lt.s32.totalorder %s289_s9, %s289_s9 }
  0x24   :  { %235 = vmatprep.subr.mxu0 %v105_v17 }
  0x25   :  { %236 = vmatpush3.msra.mxu0 %v105_v17  ;;  %p296_p13 = por %p295_p12, %p294_p11 }
  0x27   :  { %p297_p0 = pnand %p296_p13, %p290_p10 }
  0xa7   :  { %v58_v4 = vpop.xlane.xlu0 %57 }
  0xa8   :  { %v63_v5 = vmul.f32 0.03125, %v58_v4 }
  0xaa   :  { %v65_v6 = vsub.f32 %v53_v0, %v63_v5 }
  0xab   :  { %v61_v7 = vpop.xlane.xlu0 %60 }
  0xac   :  { %v64_v8 = vmul.f32 0.03125, %v61_v7  ;;  %v67_v9 = vmul.f32 %v65_v6, %v65_v6 }
  0xae   :  { %v66_v10 = vsub.f32 %v54_v1, %v64_v8  ;;  %v69_v11 = vsel %vm55_vm0, %v67_v9, 0.0 }
  0xaf   :  { %70 = vadd.xlane.f32.xlu1 %v69_v11 }
  0xb0   :  { %v68_v12 = vmul.f32 %v66_v10, %v66_v10 }
  0xb2   :  { %v72_v13 = vsel %vm55_vm0, %v68_v12, 0.0 }
  0xb3   :  { %73 = vadd.xlane.f32.xlu1 %v72_v13 }
 0x138   :  { %v71_v18 = vpop.xlane.xlu1 %70 }
 0x139   :  { %v75_v19 = vmul.f32 0.03125, %v71_v18 }
 0x13b   :  { %v77_v20 = vadd.f32 1e-05, %v75_v19 }
 0x13c   :  { %v74_v21 = vpop.xlane.xlu1 %73 }
 0x13d   :  { %245 = vrsqrt.f32 %v77_v20  ;;  %v76_v22 = vmul.f32 0.03125, %v74_v21 }
 0x13f   :  { %v78_v23 = vadd.f32 1e-05, %v76_v22 }
 0x141   :  { %247 = vrsqrt.f32 %v78_v23 }
 0x14a   :  { %v246_v24 = vpop.eup %245 }
 0x14b   :  { %v81_v26 = vmul.f32 %v246_v24, %v65_v6 }
 0x14d   :  { %v90_v28 = vmul.f32 %v218_v25, %v81_v26 }
 0x14e   :  { %v248_v29 = vpop.eup %247 }
 0x14f   :  { %v99_v30 = vadd.f32 %v219_v27, %v90_v28  ;;  %v82_v31 = vmul.f32 %v248_v29, %v66_v10 }
 0x151   :  { %101 = vst.msk [vmem:[#allocation2] sm:$0xff] %vm55_vm0, %v99_v30  ;;  %v91_v32 = vmul.f32 %v218_v25, %v82_v31 }
 0x153   :  { %v100_v33 = vadd.f32 %v219_v27, %v91_v32 }
 0x155   :  { %102 = vst.msk [vmem:[#allocation2 + $0x8] sm:$0xff] %vm55_vm0, %v100_v33 }
 0x158   :  { %v103_v34 = vld [vmem:[#allocation2] sm:$0xff] }
 0x159   :  { %237 = vmatprep.mubr.msk.f32.mxu0 %vm55_vm0, %v103_v34 }
 0x15c   :  { %v104_v35 = vld [vmem:[#allocation2 + $0x8] sm:$0xff] }
 0x15d   :  { %238 = vmatmul.mubr.msk.f32.vlgmr.msra.gmra.mxu0 %vm55_vm0, %v104_v35 }
 0x21d   :  { %v239_v37 = vpop.f32.mrf.mxu0 }
 0x21e   :  { %v195_v38 = vadd.f32 %v239_v37, %v220_v36 }
 0x21f   :  { %v189_v39 = vpop.f32.mrf.mxu0 }
 0x220   :  { %199 = vst [vmem:[#allocation8 + $0x8] sm:$0xff] %v195_v38  ;;  %v190_v40 = vadd.f32 %v220_v36, %v189_v39 }
 0x222   :  { %198 = vst [vmem:[#allocation8] sm:$0xff] %v190_v40 }
 0x223   :  { %300 = shalt.err (!%p297_p0)
}
 0x224   :  { %211 = dma.vmem_to_hbm [thread:$0]  %s206_s8, 256, %s390_s5, [#allocation5], %s316_s21, %s316_s21, %s317_s22  }
 0x225   :  { %313 = dma.done.wait [#allocation5], 256  }
 0x226   :  { %314 = vsyncadd [#allocation5], 4294967040 }
 0x227   :  { %215 = vsyncpa [#allocation4], 1 }
 0x228   :  { %216 = vsyncpa [#allocation7], 1 }
 0x229   :  { %217 = vsyncpa [#allocation5], 1 }

</bundles_post_ra>
